<compile_context>
chip_gen: v7x
topology: tpu7x:2x2x1
jax: 0.10.0
libtpu: 0.0.40
codegen_flags: <defaults>
</compile_context>

<pallas_src>
import math

import jax
import jax.numpy as jnp
from jax import lax
from jax.experimental import pallas as pl
from jax.experimental.pallas import tpu as pltpu


def _round_up(a, b):
    return (a + b - 1) // b * b


# ---------------------------------------------------------------------------
# Streaming kernel: out[0, i] = sum_k x[i, k] * h[0, k]
# ---------------------------------------------------------------------------
def _score_kernel(x_ref, h_ref, o_ref):
    # x_ref: (TILE_N, H)  -- streamed HBM tile (auto double-buffered)
    # h_ref: (1, H) f32   -- resident, tiny
    # o_ref: (1, TILE_N)  -- lane-dense output row
    x = x_ref[...]
    h = h_ref[...]
    if x.dtype != h.dtype:
        # Keep h (and the accumulation) in f32 even for low-precision x.
        x = x.astype(h.dtype)
    # h[1,H] . x[TILE_N,H]^T -> [1,TILE_N]  (contract dim 1 of both operands).
    # Equivalent to pl.dot(h, x, trans_b=True): the transposed operand is fed
    # through the MXU's stationary-operand push, so the big x tile is not
    # relaid out through the XLU, and the output row is lane-dense.
    o_ref[...] = lax.dot_general(
        h,
        x,
        dimension_numbers=(((1,), (1,)), ((), ())),
        preferred_element_type=jnp.float32,
    ).astype(o_ref.dtype)


def _choose_tile_n(n, hd, itemsize):
    """Pick the N-tile height: ~4 MiB of lane-padded rows, >=2 blocks when N allows."""
    # Per-row VMEM footprint is lane-padded to a multiple of 128 lanes.
    row_vmem_bytes = _round_up(hd, 128) * itemsize
    # ~4 MiB per x tile; double-buffered that's ~8 MiB, comfortably inside the
    # default scoped VMEM on v5e (16 MiB), v6e (32 MiB) and v7x (32 of 64 MiB).
    tile_bytes = 4 * 1024 * 1024
    tile_n = max(128, (tile_bytes // row_vmem_bytes) // 128 * 128)

    if n <= 128:
        # Single block whose dims equal the array dims (always legal, no
        # padding, no masked stores).
        return n

    # Guarantee at least 2 grid blocks so v7x's two TensorCores both stream
    # (no effect on the bytes-based tile when N is large -> many blocks).
    tile_n = min(tile_n, _round_up(pl.cdiv(n, 2), 128))
    return int(tile_n)


def discriminator_forward(x, summary, weight):
    """x: [N, H], summary: [H], weight: [H, H] -> [N]  (= sum(x * (summary @ W), dim=1))."""
    n, hd = x.shape
    assert summary.shape == (hd,)
    assert weight.shape == (hd, hd)

    # h = summary @ W: tiny one-shot matvec, off the hot path -> plain XLA,
    # kept in f32 for precision.  W never enters the streaming kernel and is
    # never required to fit in a single VMEM block.
    h_row = jnp.dot(
        summary.astype(jnp.float32).reshape(1, hd),
        weight.astype(jnp.float32),
        preferred_element_type=jnp.float32,
    )

    itemsize = jnp.dtype(x.dtype).itemsize
    tile_n = _choose_tile_n(n, hd, itemsize)
    n_blocks = pl.cdiv(n, tile_n)

    cost = pl.CostEstimate(
        flops=2 * n * hd,
        transcendentals=0,
        bytes_accessed=n * hd * itemsize + hd * 4 + n * itemsize,
    )

    out = pl.pallas_call(
        _score_kernel,
        out_shape=jax.ShapeDtypeStruct((1, n), x.dtype),
        grid=(n_blocks,),
        in_specs=[
            pl.BlockSpec((tile_n, hd), lambda i: (i, 0)),  # x: streamed over N
            pl.BlockSpec((1, hd), lambda i: (0, 0)),       # h: resident, tiny
        ],
        out_specs=pl.BlockSpec((1, tile_n), lambda i: (0, i)),
        compiler_params=pltpu.CompilerParams(
            dimension_semantics=("parallel",),
        ),
        cost_estimate=cost,
    )(x, h_row)

    return out[0]


def init_discriminator_params(key, hidden_dim, dtype=jnp.float32):
    # Matches torch_geometric's `uniform(size, tensor)`:
    #   bound = 1 / sqrt(size); tensor.uniform_(-bound, bound)
    bound = 1.0 / math.sqrt(hidden_dim)
    return jax.random.uniform(
        key, (hidden_dim, hidden_dim), dtype=dtype, minval=-bound, maxval=bound
    )


if __name__ == "__main__":
    key = jax.random.PRNGKey(0)
    k_w, k_x, k_s = jax.random.split(key, 3)

    H = 32  # hidden_dim

    weight = init_discriminator_params(k_w, H)
    summary = jax.random.normal(k_s, (H,), dtype=jnp.float32)

    # Case 1: small N (single exact block, no padding/masking).
    N1 = 8
    x1 = jax.random.normal(k_x, (N1, H), dtype=jnp.float32)
    out1 = jax.block_until_ready(discriminator_forward(x1, summary, weight))
    ref1 = jnp.sum(x1 * (summary @ weight)[None, :], axis=1)
    assert out1.shape == (N1,)
    assert jnp.allclose(out1, ref1, atol=1e-4, rtol=1e-4)

    # Case 2: N not a multiple of the tile (exercises grid > 1 + ragged last
    # block with no padding copy of x).
    N2 = 300
    x2 = jax.random.normal(jax.random.PRNGKey(1), (N2, H), dtype=jnp.float32)
    out2 = jax.block_until_ready(discriminator_forward(x2, summary, weight))
    ref2 = jnp.sum(x2 * (summary @ weight)[None, :], axis=1)
    assert out2.shape == (N2,)
    assert jnp.allclose(out2, ref2, atol=1e-4, rtol=1e-4)

    print("KERNEL_OK")
</pallas_src>

<mosaic_0001>
module attributes {stable_mosaic.version = 11 : i64} {
  func.func @_score_kernel(%arg0: i32, %arg1: memref<8x32xf32, #tpu.memory_space<vmem>>, %arg2: memref<1x32xf32, #tpu.memory_space<vmem>>, %arg3: memref<1x8xf32, #tpu.memory_space<vmem>>) attributes {dimension_semantics = [#tpu.dimension_semantics<parallel>], iteration_bounds = array<i64: 1>, scalar_prefetch = 0 : i64, scratch_operands = 0 : i64, tpu.core_type = #tpu.core_type<tc>, window_params = [{transform_indices = @transform_0, window_bounds = array<i64: 8, 32>}, {pipeline_mode = #tpu.pipeline_mode<synchronous>, transform_indices = @transform_1, window_bounds = array<i64: 1, 32>}, {transform_indices = @transform_2, window_bounds = array<i64: 1, 8>}]} {
    %c0 = arith.constant 0 : index
    %c0_0 = arith.constant 0 : index
    %0 = vector.load %arg1[%c0, %c0_0] : memref<8x32xf32, #tpu.memory_space<vmem>>, vector<8x32xf32>
    %c0_1 = arith.constant 0 : index
    %c0_2 = arith.constant 0 : index
    %1 = vector.load %arg2[%c0_1, %c0_2] : memref<1x32xf32, #tpu.memory_space<vmem>>, vector<1x32xf32>
    %cst = arith.constant dense<0.000000e+00> : vector<1x8xf32>
    %2 = tpu.matmul %1, %0, %cst {dimension_numbers = #tpu.dot_dimension_numbers<[1], [1], [0], [0], [0, 0, 1, 0], [], []>} : vector<1x32xf32>, vector<8x32xf32>, vector<1x8xf32> -> vector<1x8xf32>
    %c0_3 = arith.constant 0 : index
    %c0_4 = arith.constant 0 : index
    %3 = vector.load %arg3[%c0_3, %c0_4] : memref<1x8xf32, #tpu.memory_space<vmem>>, vector<1x8xf32>
    tpu.vector_store %arg3[%c0_3, %c0_4], %2 {strides = array<i32>} : memref<1x8xf32, #tpu.memory_space<vmem>>, vector<1x8xf32>,
    return
  }
  func.func @transform_0(%arg0: i32) -> (i32, i32) {
    %c0_i32 = arith.constant 0 : i32
    %c0_i32_0 = arith.constant 0 : i32
    return %arg0, %c0_i32 : i32, i32
  }
  func.func @transform_1(%arg0: i32) -> (i32, i32) {
    %c0_i32 = arith.constant 0 : i32
    %c0_i32_0 = arith.constant 0 : i32
    %c0_i32_1 = arith.constant 0 : i32
    return %c0_i32, %c0_i32_0 : i32, i32
  }
  func.func @transform_2(%arg0: i32) -> (i32, i32) {
    %c0_i32 = arith.constant 0 : i32
    %c0_i32_0 = arith.constant 0 : i32
    return %c0_i32, %arg0 : i32, i32
  }
}

</mosaic_0001>

<bundles_post_ra>
// kernel: tpu_custom_call.1
= control target key start
LH: loop header
LB: loop body
LE: loop exit
PB: predicated region body
PF: predicated region fallthrough
CT: control target
= control target key end

     0   :  { %7 = vsyncpa [#allocation3], 0  ;;  %s227_s0 = inlined_call_operand.hbm [shape: f32[8,32], index: 0, kind: input, shape index: {}]   ;;  %s228_s1 = inlined_call_operand.vmem [shape: f32[1,32], index: 1, kind: input, shape index: {}]   ;;  %s229_s2 = inlined_call_operand.hbm [shape: f32[1,8], index: 2, kind: output, shape index: {}]  }
   0x1   :  { %8 = vsyncpa [#allocation4], 0  ;;  %s181_s9 = smov [#allocation2]   ;;  %s133_s13 = scalar_lea.hbm %s227_s0, 128 }
   0x2   :  { %s15_s10 = sshll.u32 %s181_s9, 4  ;;  %p134_p0 = scmp.ne.s32.totalorder %s227_s0, %s133_s13  ;;  %s16_s10 = int_to_ptr.vmem [resolvable:$true] %s15_s10 }
   0x3   :  { %p137_p1 = scmp.lt.u32.totalorder %s133_s13, %s227_s0 }
   0x5   :  { %p139_p2 = pnand %p137_p1, %p134_p0 }
   0x7   :  { %142 = shalt.err (!%p139_p2)
}
   0x8   :  { %s143_s18 = scalar_lea.vmem %s16_s10, 128  ;;  %p148_p4 = scmp.lt.s32.totalorder %s16_s10, %s16_s10 }
   0x9   :  { %p144_p3 = scmp.ne.s32.totalorder %s16_s10, %s143_s18  ;;  %p149_p5 = scmp.lt.s32.totalorder %s143_s18, %s143_s18 }
   0xb   :  { %p150_p6 = por %p149_p5, %p148_p4 }
   0xd   :  { %p151_p7 = pnand %p150_p6, %p144_p3 }
   0xf   :  { %154 = shalt.err (!%p151_p7)
}
  0x10   :  { %18 = dma.hbm_to_vmem [thread:$0]  %s227_s0, 128, %s16_s10, [#allocation3]  }
  0x11   :  { %177 = dma.done.wait [#allocation3], 128  }
  0x12   :  { %178 = vsyncadd [#allocation3], 4294967168  ;;  %v182_v0 = vmov 0.0   ;;  %vm183_vm0 = vmmov 0   ;;  %vm26_vm1 = vcmask 261120   ;;  %v24_v1 = vld [vmem:[#allocation2] sm:$0xff] }
  0x13   :  { %124 = vmatprep.subr.mxu0 %v182_v0  ;;  %126 = vmatprep.mubr.msk.f32.mxu0 %vm183_vm0, %v182_v0  ;;  %v25_v2 = vld [vmem:[%s228_s1] sm:$0x1]  ;;  %s184_s23 = smov [#allocation5]   ;;  %vm103_vm2 = vcmask 57344  }
  0x14   :  { %125 = vmatpush3.xpose.msk.msra.mxu0 %vm26_vm1, %v24_v1  ;;  %s111_s24 = sshll.u32 %s184_s23, 4  ;;  %s112_s24 = int_to_ptr.vmem [resolvable:$true] %s111_s24 }
  0x15   :  { %s155_s0 = scalar_lea.vmem %s112_s24, 16  ;;  %s159_s25 = scalar_lea.vmem %s112_s24, 32 }
  0x16   :  { %p156_p8 = scmp.ne.s32.totalorder %s112_s24, %s155_s0  ;;  %p160_p9 = scmp.lt.s32.totalorder %s112_s24, %s112_s24 }
  0x17   :  { %127 = vmatmul.mubr.msk.f32.vlgmr.msra.gmra.mrb[0].mxu0 %vm26_vm1, %v25_v2  ;;  %p161_p10 = scmp.lt.s32.totalorder %s159_s25, %s155_s0 }
  0x19   :  { %p162_p11 = por %p161_p10, %p160_p9 }
  0x1b   :  { %p163_p12 = pnand %p162_p11, %p156_p8 }
  0xea   :  { %v99_v3 = vpop.f32.mrb[0].mxu0 }
  0xeb   :  { %v128_v4 = vpop.f32.mrb[1].mxu0  ;;  %104 = vst.msk [vmem:[#allocation5] sm:$0x1] %vm103_vm2, %v99_v3 }
  0xec   :  { %166 = shalt.err (!%p163_p12)
}
  0xed   :  { %s167_s1 = scalar_lea.hbm %s229_s2, 16 }
  0xee   :  { %p168_p13 = scmp.ne.s32.totalorder %s229_s2, %s167_s1  ;;  %p171_p0 = scmp.lt.u32.totalorder %s167_s1, %s229_s2 }
  0xf0   :  { %p173_p1 = pnand %p171_p0, %p168_p13 }
  0xf2   :  { %176 = shalt.err (!%p173_p1)
}
  0xf3   :  { %114 = dma.vmem_to_hbm [thread:$0]  %s112_s24, 16, %s229_s2, [#allocation4]  }
  0xf4   :  { %179 = dma.done.wait [#allocation4], 16  }
  0xf5   :  { %180 = vsyncadd [#allocation4], 4294967280 }
  0xf6   :  { %118 = vsyncpa [#allocation3], 1 }
  0xf7   :  { %119 = vsyncpa [#allocation4], 1 }

</bundles_post_ra>
